<compile_context>
chip_gen: v7x
topology: tpu7x:2x2x1
jax: 0.10.0
libtpu: 0.0.40
codegen_flags: <defaults>
</compile_context>

<pallas_src>
import jax
import jax.numpy as jnp
from jax import lax
from jax.experimental import pallas as pl
from jax.experimental.pallas import tpu as pltpu

LANE = 128


def _round_up(x, m):
    return (x + m - 1) // m * m


def vip_deeplab_losses_sum(outputs, labels):
    """outputs: {'depth': [B,1,H,W], 'semantic': [B,C,H,W]}
       labels : {'depath': [B,1,H,W], 'semantic': [B,H,W] int (-1 = ignore)}"""
    dp = outputs["depth"]
    dg = labels["depath"]
    sem = outputs["semantic"]
    lab = labels["semantic"]

    B, C, H, W = sem.shape
    HW = H * W
    orig_px = dp.size  # denominator of the depth mean (original pixels)

    # --- lane-level padding only in the rare HW % 128 != 0 case; the logits
    # are otherwise a pure reshape (no HBM copy).
    if HW % LANE != 0:
        hwp = _round_up(HW, LANE)

        def pad_last(x, value=0):
            cfg = [(0, 0)] * (x.ndim - 1) + [(0, hwp - x.shape[-1])]
            return jnp.pad(x, cfg, constant_values=value)

        dp_f = pad_last(dp.reshape(B, HW))
        dg_f = pad_last(dg.reshape(B, HW))
        sem_f = pad_last(sem.reshape(B, C, HW))
        lab_f = pad_last(lab.reshape(B, HW).astype(jnp.int32), value=-1)
    else:
        hwp = HW
        dp_f = dp.reshape(B, HW)
        dg_f = dg.reshape(B, HW)
        sem_f = sem.reshape(B, C, HW)
        lab_f = lab.reshape(B, HW).astype(jnp.int32)

    rows = hwp // LANE

    # --- tile sizing: double-buffered streamed bytes under a 12 MiB budget
    # (safe on v7x 32 MiB scoped VMEM incl. the small fused working set, big
    # enough on v5e/v6e to amortize the ~0.35 us per-grid-step overhead).
    bytes_per_px = (C * sem.dtype.itemsize + dp.dtype.itemsize
                    + dg.dtype.itemsize + 4)
    budget = 12 * 1024 * 1024
    cap_px = budget // (2 * bytes_per_px)
    cap_px = max(2048, min(131072, cap_px // 2048 * 2048))  # tile_rows % 16 == 0
    cap_rows = cap_px // LANE

    if rows <= cap_rows:
        tile_rows = rows
        n_tiles = 1
    else:
        tile_rows = cap_rows
        n_tiles = pl.cdiv(rows, tile_rows)

    # core-split so both v7x TensorCores get work (tiles rounded up; extra /
    # ragged tiles are masked in-kernel).  Harmless single extra output block
    # on single-TC chips.
    n_outer = 2 if n_tiles >= 2 else 1
    n_inner = pl.cdiv(n_tiles, n_outer)
    needs_row_mask = (n_outer * n_inner * tile_rows) != rows
    last_tile = n_tiles - 1

    dp2 = dp_f.reshape(B, rows, LANE)
    dg2 = dg_f.reshape(B, rows, LANE)
    logit2 = sem_f.reshape(B, C, rows, LANE)
    lab2 = lab_f.reshape(B, rows, LANE)

    def row_idx(b, o, i):
        return (b, jnp.minimum(o * n_inner + i, last_tile), 0)

    def logit_idx(b, o, i):
        return (b, 0, jnp.minimum(o * n_inner + i, last_tile), 0)

    def kernel(dp_ref, dg_ref, logit_ref, lab_ref, out_ref,
               acc_d, acc_ce, acc_msk):
        i = pl.program_id(2)

        @pl.when(i == 0)
        def _init():
            acc_d[...] = jnp.zeros_like(acc_d)
            acc_ce[...] = jnp.zeros_like(acc_ce)
            acc_msk[...] = jnp.zeros_like(acc_msk)

        if needs_row_mask:
            gt = pl.program_id(1) * n_inner + i
            local_row = lax.broadcasted_iota(jnp.int32, (tile_rows, LANE), 0)
            row_valid = (gt * tile_rows + local_row) < rows   # (R,128) bool
        else:
            row_valid = None

        # ---- depth branch: masked |pred - gt|, reduced to (1,128) per tile
        d = jnp.abs(dp_ref[...].astype(jnp.float32)
                    - dg_ref[...].astype(jnp.float32))
        if row_valid is not None:
            d = jnp.where(row_valid, d, 0.0)
        acc_d[...] += jnp.sum(d, axis=0, keepdims=True)

        # ---- semantic branch: per-channel fused softmax CE + NLL
        lab_t = lab_ref[...]                                  # (R,128) int32
        valid = lab_t >= 0
        if row_valid is not None:
            valid = jnp.logical_and(valid, row_valid)

        # channel max in the raw dtype (exact for bf16/f32)
        m = logit_ref[0]
        for c in range(1, C):
            m = jnp.maximum(m, logit_ref[c])
        m = m.astype(jnp.float32)

        sum_exp = jnp.zeros((tile_rows, LANE), jnp.float32)
        picked = jnp.zeros((tile_rows, LANE), jnp.float32)
        for c in range(C):
            lc = logit_ref[c].astype(jnp.float32)
            sum_exp = sum_exp + jnp.exp(lc - m)
            # TODO(synk): labels >= C pick 0 (reference clips to C-1); inputs
            # are assumed to lie in [-1, C).
            picked = jnp.where(lab_t == c, lc, picked)

        lse = m + jnp.log(sum_exp)
        # final loss only needs (lse - 2*picked) on valid pixels; where()
        # (not multiply) so garbage/ragged rows cannot leak NaNs.
        ce = jnp.where(valid, lse - 2.0 * picked, 0.0)
        acc_ce[...] += jnp.sum(ce, axis=0, keepdims=True)
        acc_msk[...] += jnp.sum(valid.astype(jnp.float32), axis=0,
                                keepdims=True)

        @pl.when(i == pl.num_programs(2) - 1)
        def _fin():
            out_ref[0:1, :] = acc_d[...]
            out_ref[1:2, :] = acc_ce[...]
            out_ref[2:3, :] = acc_msk[...]

    bytes_accessed = int(dp2.size * dp2.dtype.itemsize
                         + dg2.size * dg2.dtype.itemsize
                         + logit2.size * logit2.dtype.itemsize
                         + lab2.size * 4
                         + B * n_outer * 3 * LANE * 4)
    cost = pl.CostEstimate(
        flops=int(B * hwp * (4 + 6 * C)),
        transcendentals=int(B * hwp * (C + 1)),
        bytes_accessed=bytes_accessed)

    out = pl.pallas_call(
        kernel,
        out_shape=jax.ShapeDtypeStruct((B, n_outer, 3, LANE), jnp.float32),
        grid_spec=pltpu.PrefetchScalarGridSpec(
            num_scalar_prefetch=0,
            grid=(B, n_outer, n_inner),
            in_specs=[
                pl.BlockSpec((None, tile_rows, LANE), row_idx),       # depth pred
                pl.BlockSpec((None, tile_rows, LANE), row_idx),       # depth gt
                pl.BlockSpec((None, C, tile_rows, LANE), logit_idx),  # logits
                pl.BlockSpec((None, tile_rows, LANE), row_idx),       # labels
            ],
            out_specs=pl.BlockSpec((None, None, 3, LANE),
                                   lambda b, o, i: (b, o, 0, 0)),
            scratch_shapes=[pltpu.VMEM((1, LANE), jnp.float32)] * 3,
        ),
        compiler_params=pltpu.CompilerParams(
            dimension_semantics=("parallel", "parallel", "arbitrary"),
            vmem_limit_bytes=32 * 1024 * 1024),
        cost_estimate=cost,
    )(dp2, dg2, logit2, lab2)

    # --- tiny final combine in XLA: global normalizations over tiles/batches
    totals = jnp.sum(out, axis=(0, 1, 3))     # (3,) = depth_sum, ce_sum, ntok
    depth_sum, ce_sum, ntok = totals[0], totals[1], totals[2]
    ntok = jnp.maximum(ntok, 1.0)             # guard: fully-ignored input
    depth_l1 = depth_sum / float(orig_px)
    # ce = (lse - picked)/ntok ; nll = -picked/ntok  (fused in ce_sum)
    return depth_l1 + ce_sum / ntok


def _reference(outputs, labels):
    dp = outputs["depth"].reshape(-1).astype(jnp.float32)
    dg = labels["depath"].reshape(-1).astype(jnp.float32)
    depth_l1 = jnp.mean(jnp.abs(dp - dg))

    sem = outputs["semantic"]
    b, c, h, w = sem.shape
    logits = jnp.transpose(sem, (0, 2, 3, 1)).reshape(-1, c).astype(jnp.float32)
    lab = labels["semantic"].reshape(-1).astype(jnp.int32)
    logp = jax.nn.log_softmax(logits, axis=-1)
    mask = (lab >= 0).astype(jnp.float32)
    num_tokens = jnp.sum(mask)
    safe = jnp.clip(lab, 0, c - 1)
    ce = -jnp.sum(jnp.take_along_axis(logp, safe[:, None], axis=-1)[:, 0] * mask) / num_tokens
    nll = -jnp.sum(jnp.take_along_axis(logits, safe[:, None], axis=-1)[:, 0] * mask) / num_tokens
    return depth_l1 + ce + nll


if __name__ == "__main__":
    key = jax.random.PRNGKey(0)
    k1, k2, k3, k4 = jax.random.split(key, 4)
    B, C, H, W = 2, 4, 16, 16

    outputs = {
        "depth": jax.random.normal(k1, (B, 1, H, W), dtype=jnp.float32),
        "semantic": jax.random.normal(k2, (B, C, H, W), dtype=jnp.float32),
    }
    labels = {
        "depath": jax.random.normal(k3, (B, 1, H, W), dtype=jnp.float32),
        # integer class ids in [-1, C), -1 marks ignored tokens
        "semantic": jax.random.randint(k4, (B, H, W), -1, C, dtype=jnp.int32),
    }

    loss = jax.block_until_ready(vip_deeplab_losses_sum(outputs, labels))
    ref = jax.block_until_ready(_reference(outputs, labels))
    assert jnp.allclose(loss, ref, rtol=1e-5, atol=1e-5), (loss, ref)

    # TODO(synk): depth_loss/cseloss are not defined in the original losses.py;
    # mean-L1 and masked softmax CE are used as standard stand-ins.
    print("KERNEL_OK")
</pallas_src>

<mosaic_0001>
module attributes {stable_mosaic.version = 11 : i64} {
  func.func @kernel(%arg0: i32, %arg1: i32, %arg2: i32, %arg3: memref<1x2x128xf32, #tpu.memory_space<vmem>>, %arg4: memref<1x2x128xf32, #tpu.memory_space<vmem>>, %arg5: memref<1x4x2x128xf32, #tpu.memory_space<vmem>>, %arg6: memref<1x2x128xi32, #tpu.memory_space<vmem>>, %arg7: memref<1x1x3x128xf32, #tpu.memory_space<vmem>>, %arg8: memref<1x128xf32, #tpu.memory_space<vmem>>, %arg9: memref<1x128xf32, #tpu.memory_space<vmem>>, %arg10: memref<1x128xf32, #tpu.memory_space<vmem>>) attributes {dimension_semantics = [#tpu.dimension_semantics<parallel>, #tpu.dimension_semantics<parallel>, #tpu.dimension_semantics<arbitrary>], iteration_bounds = array<i64: 2, 1, 1>, scalar_prefetch = 0 : i64, scratch_operands = 3 : i64, tpu.core_type = #tpu.core_type<tc>, window_params = [{transform_indices = @transform_0, window_bounds = array<i64: 1, 2, 128>}, {transform_indices = @transform_1, window_bounds = array<i64: 1, 2, 128>}, {transform_indices = @transform_2, window_bounds = array<i64: 1, 4, 2, 128>}, {transform_indices = @transform_3, window_bounds = array<i64: 1, 2, 128>}, {transform_indices = @transform_4, window_bounds = array<i64: 1, 1, 3, 128>}]} {
    %c0_i32 = arith.constant 0 : i32
    %0 = arith.cmpi eq, %arg2, %c0_i32 : i32
    %1 = arith.extui %0 : i1 to i32
    %c0_i32_0 = arith.constant 0 : i32
    %2 = arith.cmpi ne, %1, %c0_i32_0 : i32
    scf.if %2 {
      %cst_60 = arith.constant 0.000000e+00 : f32
      %85 = vector.broadcast %cst_60 : f32 to vector<1x128xf32>
      %c0_61 = arith.constant 0 : index
      %c0_62 = arith.constant 0 : index
      %86 = vector.load %arg8[%c0_61, %c0_62] : memref<1x128xf32, #tpu.memory_space<vmem>>, vector<1x128xf32>
      tpu.vector_store %arg8[%c0_61, %c0_62], %85 {strides = array<i32>} : memref<1x128xf32, #tpu.memory_space<vmem>>, vector<1x128xf32>,
      %cst_63 = arith.constant 0.000000e+00 : f32
      %87 = vector.broadcast %cst_63 : f32 to vector<1x128xf32>
      %c0_64 = arith.constant 0 : index
      %c0_65 = arith.constant 0 : index
      %88 = vector.load %arg9[%c0_64, %c0_65] : memref<1x128xf32, #tpu.memory_space<vmem>>, vector<1x128xf32>
      tpu.vector_store %arg9[%c0_64, %c0_65], %87 {strides = array<i32>} : memref<1x128xf32, #tpu.memory_space<vmem>>, vector<1x128xf32>,
      %cst_66 = arith.constant 0.000000e+00 : f32
      %89 = vector.broadcast %cst_66 : f32 to vector<1x128xf32>
      %c0_67 = arith.constant 0 : index
      %c0_68 = arith.constant 0 : index
      %90 = vector.load %arg10[%c0_67, %c0_68] : memref<1x128xf32, #tpu.memory_space<vmem>>, vector<1x128xf32>
      tpu.vector_store %arg10[%c0_67, %c0_68], %89 {strides = array<i32>} : memref<1x128xf32, #tpu.memory_space<vmem>>, vector<1x128xf32>,
    } else {
    }
    %c0 = arith.constant 0 : index
    %c0_1 = arith.constant 0 : index
    %c0_2 = arith.constant 0 : index
    %3 = vector.load %arg3[%c0, %c0_1, %c0_2] : memref<1x2x128xf32, #tpu.memory_space<vmem>>, vector<1x2x128xf32>
    %4 = vector.shape_cast %3 : vector<1x2x128xf32> to vector<2x128xf32>
    %c0_3 = arith.constant 0 : index
    %c0_4 = arith.constant 0 : index
    %c0_5 = arith.constant 0 : index
    %5 = vector.load %arg4[%c0_3, %c0_4, %c0_5] : memref<1x2x128xf32, #tpu.memory_space<vmem>>, vector<1x2x128xf32>
    %6 = vector.shape_cast %5 : vector<1x2x128xf32> to vector<2x128xf32>
    %7 = arith.subf %4, %6 : vector<2x128xf32>
    %8 = math.absf %7 : vector<2x128xf32>
    %c0_6 = arith.constant 0 : index
    %c0_7 = arith.constant 0 : index
    %9 = vector.load %arg8[%c0_6, %c0_7] : memref<1x128xf32, #tpu.memory_space<vmem>>, vector<1x128xf32>
    %cst = arith.constant dense<0.000000e+00> : vector<128xf32>
    %10 = vector.multi_reduction <add>, %8, %cst [0] : vector<2x128xf32> to vector<128xf32>
    %11 = vector.shape_cast %10 : vector<128xf32> to vector<1x128xf32>
    %12 = arith.addf %9, %11 : vector<1x128xf32>
    %c0_8 = arith.constant 0 : index
    %c0_9 = arith.constant 0 : index
    %13 = vector.load %arg8[%c0_8, %c0_9] : memref<1x128xf32, #tpu.memory_space<vmem>>, vector<1x128xf32>
    tpu.vector_store %arg8[%c0_8, %c0_9], %12 {strides = array<i32>} : memref<1x128xf32, #tpu.memory_space<vmem>>, vector<1x128xf32>,
    %c0_10 = arith.constant 0 : index
    %c0_11 = arith.constant 0 : index
    %c0_12 = arith.constant 0 : index
    %14 = vector.load %arg6[%c0_10, %c0_11, %c0_12] : memref<1x2x128xi32, #tpu.memory_space<vmem>>, vector<1x2x128xi32>
    %15 = vector.shape_cast %14 : vector<1x2x128xi32> to vector<2x128xi32>
    %c0_i32_13 = arith.constant 0 : i32
    %16 = vector.broadcast %c0_i32_13 : i32 to vector<2x128xi32>
    %17 = arith.cmpi sge, %15, %16 : vector<2x128xi32>
    %c0_14 = arith.constant 0 : index
    %c0_15 = arith.constant 0 : index
    %c0_16 = arith.constant 0 : index
    %c0_17 = arith.constant 0 : index
    %18 = vector.load %arg5[%c0_14, %c0_15, %c0_16, %c0_17] : memref<1x4x2x128xf32, #tpu.memory_space<vmem>>, vector<1x1x2x128xf32>
    %19 = vector.shape_cast %18 : vector<1x1x2x128xf32> to vector<2x128xf32>
    %c0_18 = arith.constant 0 : index
    %c1 = arith.constant 1 : index
    %c0_19 = arith.constant 0 : index
    %c0_20 = arith.constant 0 : index
    %20 = vector.load %arg5[%c0_18, %c1, %c0_19, %c0_20] : memref<1x4x2x128xf32, #tpu.memory_space<vmem>>, vector<1x1x2x128xf32>
    %21 = vector.shape_cast %20 : vector<1x1x2x128xf32> to vector<2x128xf32>
    %22 = arith.maximumf %19, %21 : vector<2x128xf32>
    %c0_21 = arith.constant 0 : index
    %c2 = arith.constant 2 : index
    %c0_22 = arith.constant 0 : index
    %c0_23 = arith.constant 0 : index
    %23 = vector.load %arg5[%c0_21, %c2, %c0_22, %c0_23] : memref<1x4x2x128xf32, #tpu.memory_space<vmem>>, vector<1x1x2x128xf32>
    %24 = vector.shape_cast %23 : vector<1x1x2x128xf32> to vector<2x128xf32>
    %25 = arith.maximumf %22, %24 : vector<2x128xf32>
    %c0_24 = arith.constant 0 : index
    %c3 = arith.constant 3 : index
    %c0_25 = arith.constant 0 : index
    %c0_26 = arith.constant 0 : index
    %26 = vector.load %arg5[%c0_24, %c3, %c0_25, %c0_26] : memref<1x4x2x128xf32, #tpu.memory_space<vmem>>, vector<1x1x2x128xf32>
    %27 = vector.shape_cast %26 : vector<1x1x2x128xf32> to vector<2x128xf32>
    %28 = arith.maximumf %25, %27 : vector<2x128xf32>
    %cst_27 = arith.constant 0.000000e+00 : f32
    %29 = vector.broadcast %cst_27 : f32 to vector<2x128xf32>
    %cst_28 = arith.constant 0.000000e+00 : f32
    %30 = vector.broadcast %cst_28 : f32 to vector<2x128xf32>
    %c0_29 = arith.constant 0 : index
    %c0_30 = arith.constant 0 : index
    %c0_31 = arith.constant 0 : index
    %c0_32 = arith.constant 0 : index
    %31 = vector.load %arg5[%c0_29, %c0_30, %c0_31, %c0_32] : memref<1x4x2x128xf32, #tpu.memory_space<vmem>>, vector<1x1x2x128xf32>
    %32 = vector.shape_cast %31 : vector<1x1x2x128xf32> to vector<2x128xf32>
    %33 = arith.subf %32, %28 : vector<2x128xf32>
    %34 = math.exp %33 : vector<2x128xf32>
    %35 = arith.addf %29, %34 : vector<2x128xf32>
    %c0_i32_33 = arith.constant 0 : i32
    %36 = vector.broadcast %c0_i32_33 : i32 to vector<2x128xi32>
    %37 = arith.cmpi eq, %15, %36 : vector<2x128xi32>
    %38 = arith.select %37, %32, %30 : vector<2x128xi1>, vector<2x128xf32>
    %c0_34 = arith.constant 0 : index
    %c1_35 = arith.constant 1 : index
    %c0_36 = arith.constant 0 : index
    %c0_37 = arith.constant 0 : index
    %39 = vector.load %arg5[%c0_34, %c1_35, %c0_36, %c0_37] : memref<1x4x2x128xf32, #tpu.memory_space<vmem>>, vector<1x1x2x128xf32>
    %40 = vector.shape_cast %39 : vector<1x1x2x128xf32> to vector<2x128xf32>
    %41 = arith.subf %40, %28 : vector<2x128xf32>
    %42 = math.exp %41 : vector<2x128xf32>
    %43 = arith.addf %35, %42 : vector<2x128xf32>
    %c1_i32 = arith.constant 1 : i32
    %44 = vector.broadcast %c1_i32 : i32 to vector<2x128xi32>
    %45 = arith.cmpi eq, %15, %44 : vector<2x128xi32>
    %46 = arith.select %45, %40, %38 : vector<2x128xi1>, vector<2x128xf32>
    %c0_38 = arith.constant 0 : index
    %c2_39 = arith.constant 2 : index
    %c0_40 = arith.constant 0 : index
    %c0_41 = arith.constant 0 : index
    %47 = vector.load %arg5[%c0_38, %c2_39, %c0_40, %c0_41] : memref<1x4x2x128xf32, #tpu.memory_space<vmem>>, vector<1x1x2x128xf32>
    %48 = vector.shape_cast %47 : vector<1x1x2x128xf32> to vector<2x128xf32>
    %49 = arith.subf %48, %28 : vector<2x128xf32>
    %50 = math.exp %49 : vector<2x128xf32>
    %51 = arith.addf %43, %50 : vector<2x128xf32>
    %c2_i32 = arith.constant 2 : i32
    %52 = vector.broadcast %c2_i32 : i32 to vector<2x128xi32>
    %53 = arith.cmpi eq, %15, %52 : vector<2x128xi32>
    %54 = arith.select %53, %48, %46 : vector<2x128xi1>, vector<2x128xf32>
    %c0_42 = arith.constant 0 : index
    %c3_43 = arith.constant 3 : index
    %c0_44 = arith.constant 0 : index
    %c0_45 = arith.constant 0 : index
    %55 = vector.load %arg5[%c0_42, %c3_43, %c0_44, %c0_45] : memref<1x4x2x128xf32, #tpu.memory_space<vmem>>, vector<1x1x2x128xf32>
    %56 = vector.shape_cast %55 : vector<1x1x2x128xf32> to vector<2x128xf32>
    %57 = arith.subf %56, %28 : vector<2x128xf32>
    %58 = math.exp %57 : vector<2x128xf32>
    %59 = arith.addf %51, %58 : vector<2x128xf32>
    %c3_i32 = arith.constant 3 : i32
    %60 = vector.broadcast %c3_i32 : i32 to vector<2x128xi32>
    %61 = arith.cmpi eq, %15, %60 : vector<2x128xi32>
    %62 = arith.select %61, %56, %54 : vector<2x128xi1>, vector<2x128xf32>
    %63 = math.log %59 : vector<2x128xf32>
    %64 = arith.addf %28, %63 : vector<2x128xf32>
    %cst_46 = arith.constant 2.000000e+00 : f32
    %65 = vector.broadcast %cst_46 : f32 to vector<2x128xf32>
    %66 = arith.mulf %65, %62 : vector<2x128xf32>
    %67 = arith.subf %64, %66 : vector<2x128xf32>
    %cst_47 = arith.constant 0.000000e+00 : f32
    %68 = vector.broadcast %cst_47 : f32 to vector<2x128xf32>
    %69 = arith.select %17, %67, %68 : vector<2x128xi1>, vector<2x128xf32>
    %c0_48 = arith.constant 0 : index
    %c0_49 = arith.constant 0 : index
    %70 = vector.load %arg9[%c0_48, %c0_49] : memref<1x128xf32, #tpu.memory_space<vmem>>, vector<1x128xf32>
    %cst_50 = arith.constant dense<0.000000e+00> : vector<128xf32>
    %71 = vector.multi_reduction <add>, %69, %cst_50 [0] : vector<2x128xf32> to vector<128xf32>
    %72 = vector.shape_cast %71 : vector<128xf32> to vector<1x128xf32>
    %73 = arith.addf %70, %72 : vector<1x128xf32>
    %c0_51 = arith.constant 0 : index
    %c0_52 = arith.constant 0 : index
    %74 = vector.load %arg9[%c0_51, %c0_52] : memref<1x128xf32, #tpu.memory_space<vmem>>, vector<1x128xf32>
    tpu.vector_store %arg9[%c0_51, %c0_52], %73 {strides = array<i32>} : memref<1x128xf32, #tpu.memory_space<vmem>>, vector<1x128xf32>,
    %c0_53 = arith.constant 0 : index
    %c0_54 = arith.constant 0 : index
    %75 = vector.load %arg10[%c0_53, %c0_54] : memref<1x128xf32, #tpu.memory_space<vmem>>, vector<1x128xf32>
    %76 = arith.extui %17 : vector<2x128xi1> to vector<2x128xi32>
    %77 = arith.sitofp %76 : vector<2x128xi32> to vector<2x128xf32>
    %cst_55 = arith.constant dense<0.000000e+00> : vector<128xf32>
    %78 = vector.multi_reduction <add>, %77, %cst_55 [0] : vector<2x128xf32> to vector<128xf32>
    %79 = vector.shape_cast %78 : vector<128xf32> to vector<1x128xf32>
    %80 = arith.addf %75, %79 : vector<1x128xf32>
    %c0_56 = arith.constant 0 : index
    %c0_57 = arith.constant 0 : index
    %81 = vector.load %arg10[%c0_56, %c0_57] : memref<1x128xf32, #tpu.memory_space<vmem>>, vector<1x128xf32>
    tpu.vector_store %arg10[%c0_56, %c0_57], %80 {strides = array<i32>} : memref<1x128xf32, #tpu.memory_space<vmem>>, vector<1x128xf32>,
    %c0_i32_58 = arith.constant 0 : i32
    %82 = arith.cmpi eq, %arg2, %c0_i32_58 : i32
    %83 = arith.extui %82 : i1 to i32
    %c0_i32_59 = arith.constant 0 : i32
    %84 = arith.cmpi ne, %83, %c0_i32_59 : i32
    scf.if %84 {
      %c0_60 = arith.constant 0 : index
      %c0_61 = arith.constant 0 : index
      %85 = vector.load %arg8[%c0_60, %c0_61] : memref<1x128xf32, #tpu.memory_space<vmem>>, vector<1x128xf32>
      %c0_62 = arith.constant 0 : index
      %c0_63 = arith.constant 0 : index
      %c0_64 = arith.constant 0 : index
      %c0_65 = arith.constant 0 : index
      %86 = vector.load %arg7[%c0_62, %c0_63, %c0_64, %c0_65] : memref<1x1x3x128xf32, #tpu.memory_space<vmem>>, vector<1x1x1x128xf32>
      %87 = vector.shape_cast %86 : vector<1x1x1x128xf32> to vector<1x128xf32>
      %88 = vector.shape_cast %85 : vector<1x128xf32> to vector<1x1x1x128xf32>
      tpu.vector_store %arg7[%c0_62, %c0_63, %c0_64, %c0_65], %88 {strides = array<i32>} : memref<1x1x3x128xf32, #tpu.memory_space<vmem>>, vector<1x1x1x128xf32>,
      %c0_66 = arith.constant 0 : index
      %c0_67 = arith.constant 0 : index
      %89 = vector.load %arg9[%c0_66, %c0_67] : memref<1x128xf32, #tpu.memory_space<vmem>>, vector<1x128xf32>
      %c0_68 = arith.constant 0 : index
      %c0_69 = arith.constant 0 : index
      %c1_70 = arith.constant 1 : index
      %c0_71 = arith.constant 0 : index
      %90 = vector.load %arg7[%c0_68, %c0_69, %c1_70, %c0_71] : memref<1x1x3x128xf32, #tpu.memory_space<vmem>>, vector<1x1x1x128xf32>
      %91 = vector.shape_cast %90 : vector<1x1x1x128xf32> to vector<1x128xf32>
      %92 = vector.shape_cast %89 : vector<1x128xf32> to vector<1x1x1x128xf32>
      tpu.vector_store %arg7[%c0_68, %c0_69, %c1_70, %c0_71], %92 {strides = array<i32>} : memref<1x1x3x128xf32, #tpu.memory_space<vmem>>, vector<1x1x1x128xf32>,
      %c0_72 = arith.constant 0 : index
      %c0_73 = arith.constant 0 : index
      %93 = vector.load %arg10[%c0_72, %c0_73] : memref<1x128xf32, #tpu.memory_space<vmem>>, vector<1x128xf32>
      %c0_74 = arith.constant 0 : index
      %c0_75 = arith.constant 0 : index
      %c2_76 = arith.constant 2 : index
      %c0_77 = arith.constant 0 : index
      %94 = vector.load %arg7[%c0_74, %c0_75, %c2_76, %c0_77] : memref<1x1x3x128xf32, #tpu.memory_space<vmem>>, vector<1x1x1x128xf32>
      %95 = vector.shape_cast %94 : vector<1x1x1x128xf32> to vector<1x128xf32>
      %96 = vector.shape_cast %93 : vector<1x128xf32> to vector<1x1x1x128xf32>
      tpu.vector_store %arg7[%c0_74, %c0_75, %c2_76, %c0_77], %96 {strides = array<i32>} : memref<1x1x3x128xf32, #tpu.memory_space<vmem>>, vector<1x1x1x128xf32>,
    } else {
    }
    return
  }
  func.func @transform_0(%arg0: i32, %arg1: i32, %arg2: i32) -> (i32, i32, i32) {
    %c1_i32 = arith.constant 1 : i32
    %0 = arith.muli %arg1, %c1_i32 : i32
    %1 = arith.addi %0, %arg2 : i32
    %c0_i32 = arith.constant 0 : i32
    %2 = arith.minsi %1, %c0_i32 : i32
    %c0_i32_0 = arith.constant 0 : i32
    %c0_i32_1 = arith.constant 0 : i32
    return %arg0, %2, %c0_i32_0 : i32, i32, i32
  }
  func.func @transform_1(%arg0: i32, %arg1: i32, %arg2: i32) -> (i32, i32, i32) {
    %c1_i32 = arith.constant 1 : i32
    %0 = arith.muli %arg1, %c1_i32 : i32
    %1 = arith.addi %0, %arg2 : i32
    %c0_i32 = arith.constant 0 : i32
    %2 = arith.minsi %1, %c0_i32 : i32
    %c0_i32_0 = arith.constant 0 : i32
    %c0_i32_1 = arith.constant 0 : i32
    return %arg0, %2, %c0_i32_0 : i32, i32, i32
  }
  func.func @transform_2(%arg0: i32, %arg1: i32, %arg2: i32) -> (i32, i32, i32, i32) {
    %c1_i32 = arith.constant 1 : i32
    %0 = arith.muli %arg1, %c1_i32 : i32
    %1 = arith.addi %0, %arg2 : i32
    %c0_i32 = arith.constant 0 : i32
    %2 = arith.minsi %1, %c0_i32 : i32
    %c0_i32_0 = arith.constant 0 : i32
    %c0_i32_1 = arith.constant 0 : i32
    %c0_i32_2 = arith.constant 0 : i32
    return %arg0, %c0_i32_0, %2, %c0_i32_1 : i32, i32, i32, i32
  }
  func.func @transform_3(%arg0: i32, %arg1: i32, %arg2: i32) -> (i32, i32, i32) {
    %c1_i32 = arith.constant 1 : i32
    %0 = arith.muli %arg1, %c1_i32 : i32
    %1 = arith.addi %0, %arg2 : i32
    %c0_i32 = arith.constant 0 : i32
    %2 = arith.minsi %1, %c0_i32 : i32
    %c0_i32_0 = arith.constant 0 : i32
    %c0_i32_1 = arith.constant 0 : i32
    return %arg0, %2, %c0_i32_0 : i32, i32, i32
  }
  func.func @transform_4(%arg0: i32, %arg1: i32, %arg2: i32) -> (i32, i32, i32, i32) {
    %c0_i32 = arith.constant 0 : i32
    %c0_i32_0 = arith.constant 0 : i32
    %c0_i32_1 = arith.constant 0 : i32
    return %arg0, %arg1, %c0_i32, %c0_i32_0 : i32, i32, i32, i32
  }
}

</mosaic_0001>

<bundles_post_ra>
// kernel: tpu_custom_call.1
= control target key start
LH: loop header
LB: loop body
LE: loop exit
PB: predicated region body
PF: predicated region fallthrough
CT: control target
= control target key end

     0   :  { %9 = vsyncpa [#allocation6], 0  ;;  %s1166_s0 = inlined_call_operand.hbm [shape: f32[2,2,128], index: 0, kind: input, shape index: {}]   ;;  %s1167_s1 = inlined_call_operand.hbm [shape: f32[2,2,128], index: 1, kind: input, shape index: {}]   ;;  %s1168_s2 = inlined_call_operand.hbm [shape: f32[2,4,2,128], index: 2, kind: input, shape index: {}]   ;;  %s1169_s3 = inlined_call_operand.vmem [shape: s32[2,2,128], index: 3, kind: input, shape index: {}]   ;;  %s1170_s4 = inlined_call_operand.vmem [shape: f32[2,1,3,128], index: 4, kind: output, shape index: {}]  }
   0x1   :  { %11 = vsyncpa [#allocation6 + $0x1], 0 }
   0x2   :  { %12 = vsyncpa [#allocation8], 0 }
   0x3   :  { %14 = vsyncpa [#allocation8 + $0x1], 0  ;;  %s930_s15 = smov 0   ;;  %s932_s16 = smov 0  }
   0x4   :  { %s934_s17 = smov 0   ;;  %s936_s18 = smov 0  }
   0x5   :  { %s938_s19 = smov 0   ;;  %s940_s20 = smov 0  }
   0x6 LB: > { %s1172_s21 = sadd.s32 4294967295, %s897_s20   ;;  %s39_s22 = sadd.s32 1, %s893_s19  ;;  %s897_s20 = sphi %s940_s20, %s20_s20   ;;  %s893_s19 = sphi %s938_s19, %s1184_s19   ;;  %s889_s18 = sphi %s936_s18, %s1183_s18   ;;  %s885_s17 = sphi %s934_s17, %s1182_s17   ;;  %s881_s16 = sphi %s932_s16, %s1181_s16   ;;  %s877_s15 = sphi %s930_s15, %s1180_s15  }
   0x7   : > { %p41_p0 = scmp.ge.s32.totalorder %s39_s22, 2  ;;  %s54_s23 = sadd.s32 1, %s885_s17 }
   0x8   : > { %p61_p1 = scmp.ne.s32.totalorder %s885_s17, %s881_s16  ;;  %p62_p2 = scmp.eq.s32.totalorder %s897_s20, 0 }
   0x9   : > { %s1186_s22 = smov (%p41_p0, %s39_s22), 0  ;;  %p67_p4 = scmp.ne.s32.totalorder %s881_s16, %s877_s15 }
   0xa   : > { %p63_p3 = por %p62_p2, %p61_p1  ;;  %s49_s24 = ssub.s32 %s893_s19, %s1186_s22 }
   0xb   : > { %p68_p5 = scmp.eq.s32.totalorder %s1172_s21, 0  ;;  %p52_p6 = scmp.eq.s32.totalorder %s49_s24, 0 }
   0xc   : > { %p691_p8 = scmp.lt.s32.totalorder %s897_s20, 2  ;;  %s980_s27 = sand.u32 1, %s885_s17  }
   0xd   : > { %p971_p7 = por %p68_p5, %p67_p4  ;;  %s656_s28 = sshll.u32 %s893_s19, 5 }
   0xe   : > { %s977_s26 = scalar_select %p52_p6, %s885_s17, %s54_s23  }
   0xf   : > { %s1173_s25 = scalar_select %p971_p7, 1, 0 }
  0x10   : > { %s655_s29 = sshll.u32 %s980_s27, 1  ;;  %p984_p9 = pnand %p691_p8, %p63_p3 }
  0x11   : > { %s243_s5 = sand.u32 1, %s897_s20   ;;  %s994_s8 = scalar_lea.hbm %s1167_s1, %s656_s28 }
  0x12   : > { %s247_s9 = scalar_lea.vmem [#allocation7], %s655_s29  ;;  %s659_s11 = sshll.u32 %s980_s27, 3 }
  0x13   : > { %s258_s10 = sshll.u32 %s247_s9, 4  ;;  %s1001_s12 = scalar_lea.sflag [#allocation8], %s243_s5  ;;  %s998_s10 = int_to_ptr.vmem [resolvable:$true] %s258_s10 }
  0x14   : > { %s753_s13 = scalar_lea.hbm %s994_s8, 32  ;;  %p1007_p11 = pneg %p984_p9 }
  0x15   : > { %p754_p10 = scmp.ne.s32.totalorder %s994_s8, %s753_s13  ;;  %s758_s24 = scalar_lea.hbm %s1167_s1, 64 }
  0x16   : > { %p759_p0 = scmp.lt.u32.totalorder %s994_s8, %s1167_s1  ;;  %p760_p1 = scmp.lt.u32.totalorder %s758_s24, %s753_s13 }
  0x17   : > { %p756_p12 = pnand %p1007_p11, %p754_p10  ;;  %p762_p3 = scmp.lt.u32.totalorder %s753_s13, %s994_s8 }
  0x18   : > { %p761_p2 = por %p760_p1, %p759_p0 }
  0x19   : > { %p757_p13 = pneg %p756_p12 }
  0x1a   : > { %p763_p4 = por %p762_p3, %p761_p2 }
  0x1c   : > { %p764_p5 = pnand %p763_p4, %p757_p13 }
  0x1e   : > { %767 = shalt.err (!%p764_p5)
}
  0x1f   : > { %s768_s5 = scalar_lea.vmem %s998_s10, 32  ;;  %s899_s9 = smov [#allocation7]  }
  0x20   : > { %p769_p6 = scmp.ne.s32.totalorder %s998_s10, %s768_s5  ;;  %s773_s15 = sshll.u32 %s899_s9, 4  ;;  %s774_s15 = int_to_ptr.vmem [resolvable:$false] %s773_s15 }
  0x21   : > { %s775_s23 = scalar_lea.vmem %s774_s15, 64  ;;  %p776_p12 = scmp.lt.s32.totalorder %s998_s10, %s774_s15 }
  0x22   : > { %p771_p8 = pnand %p769_p6, %p1007_p11  ;;  %p777_p7 = scmp.lt.s32.totalorder %s775_s23, %s768_s5 }
  0x24   : > { %p772_p10 = pneg %p771_p8  ;;  %p778_p0 = por %p777_p7, %p776_p12 }
  0x26   : > { %p779_p1 = pnand %p778_p0, %p772_p10 }
  0x28   : > { %782 = shalt.err (!%p779_p1)
}
  0x29   : > { %687 = dma.hbm_to_vmem [thread:$0]  (!%p984_p9), %s994_s8, 32, %s998_s10, %s1001_s12  }
  0x2a   : > { %p662_p13 = scmp.ge.s32.totalorder %s897_s20, 1  ;;  %s269_s13 = scalar_lea.vmem [#allocation9], %s659_s11 }
  0x2b   : > { %s280_s24 = sshll.u32 %s269_s13, 4  ;;  %p304_p7 = scmp.lt.s32.totalorder %s897_s20, 3  ;;  %s1035_s24 = int_to_ptr.vmem [resolvable:$true] %s280_s24 }
  0x2c   : > { %s1046_s9 = scalar_lea.hbm %s1166_s0, %s656_s28  ;;  %s225_s8 = scalar_lea.vmem [#allocation5], %s655_s29 }
  0x2d   : > { %p1037_p2 = pnand %p662_p13, %p304_p7  ;;  %s236_s10 = sshll.u32 %s225_s8, 4  ;;  %s1050_s10 = int_to_ptr.vmem [resolvable:$true] %s236_s10 }
  0x2e   : > { %s674_s11 = sshll.u32 %s893_s19, 7  ;;  %s222_s15 = scalar_lea.sflag [#allocation6], %s980_s27 }
  0x2f   : > { %s1176_s6 = scalar_select %p1037_p2, 1, 0 }
  0x30   : > { %s783_s23 = scalar_lea.hbm %s1046_s9, 32  ;;  %s788_s28 = scalar_lea.hbm %s1166_s0, 64 }
  0x31   : > { %p784_p3 = scmp.ne.s32.totalorder %s1046_s9, %s783_s23  ;;  %p789_p6 = scmp.lt.u32.totalorder %s1046_s9, %s1166_s0 }
  0x32   : > { %p790_p8 = scmp.lt.u32.totalorder %s788_s28, %s783_s23  ;;  %p792_p12 = scmp.lt.u32.totalorder %s783_s23, %s1046_s9 }
  0x33   : > { %p786_p4 = pnand %p784_p3, %p1007_p11 }
  0x34   : > { %p791_p10 = por %p790_p8, %p789_p6 }
  0x35   : > { %p787_p5 = pneg %p786_p4 }
  0x36   : > { %p793_p0 = por %p792_p12, %p791_p10 }
  0x38   : > { %p794_p1 = pnand %p793_p0, %p787_p5 }
  0x3a   : > { %797 = shalt.err (!%p794_p1)
}
  0x3b   : > { %s798_s27 = scalar_lea.vmem %s1050_s10, 32  ;;  %s900_s29 = smov [#allocation5]  }
  0x3c   : > { %p799_p13 = scmp.ne.s32.totalorder %s1050_s10, %s798_s27  ;;  %s803_s8 = sshll.u32 %s900_s29, 4  ;;  %s804_s8 = int_to_ptr.vmem [resolvable:$false] %s803_s8 }
  0x3d   : > { %s805_s21 = scalar_lea.vmem %s804_s8, 64  ;;  %p806_p4 = scmp.lt.s32.totalorder %s1050_s10, %s804_s8 }
  0x3e   : > { %p801_p7 = pnand %p799_p13, %p1007_p11  ;;  %p807_p2 = scmp.lt.s32.totalorder %s805_s21, %s798_s27 }
  0x40   : > { %p802_p3 = pneg %p801_p7  ;;  %p808_p6 = por %p807_p2, %p806_p4 }
  0x42   : > { %p809_p8 = pnand %p808_p6, %p802_p3 }
  0x44   : > { %812 = shalt.err (!%p809_p8)
}
  0x45   : > { %684 = dma.hbm_to_vmem [thread:$0]  (!%p984_p9), %s1046_s9, 32, %s1050_s10, %s222_s15  }
  0x46   : > { %s1080_s7 = scalar_lea.hbm %s1168_s2, %s674_s11  ;;  %s818_s29 = scalar_lea.hbm %s1168_s2, 256 }
  0x47   : > { %s813_s28 = scalar_lea.hbm %s1080_s7, 128  ;;  %p819_p12 = scmp.lt.u32.totalorder %s1080_s7, %s1168_s2 }
  0x48   : > { %p814_p2 = scmp.ne.s32.totalorder %s1080_s7, %s813_s28  ;;  %p820_p0 = scmp.lt.u32.totalorder %s818_s29, %s813_s28 }
  0x49   : > { %p822_p13 = scmp.lt.u32.totalorder %s813_s28, %s1080_s7 }
  0x4a   : > { %p816_p5 = pnand %p814_p2, %p1007_p11  ;;  %p821_p1 = por %p820_p0, %p819_p12 }
  0x4c   : > { %p817_p10 = pneg %p816_p5  ;;  %p823_p7 = por %p822_p13, %p821_p1 }
  0x4e   : > { %p824_p3 = pnand %p823_p7, %p817_p10 }
  0x50   : > { %827 = shalt.err (!%p824_p3)
}
  0x51   : > { %s828_s11 = scalar_lea.vmem %s1035_s24, 128  ;;  %s901_s15 = smov [#allocation9]  }
  0x52   : > { %p829_p4 = scmp.ne.s32.totalorder %s1035_s24, %s828_s11  ;;  %s833_s8 = sshll.u32 %s901_s15, 4  ;;  %s834_s8 = int_to_ptr.vmem [resolvable:$false] %s833_s8 }
  0x53   : > { %s835_s21 = scalar_lea.vmem %s834_s8, 256  ;;  %p836_p2 = scmp.lt.s32.totalorder %s1035_s24, %s834_s8 }
  0x54   : > { %p831_p6 = pnand %p829_p4, %p1007_p11  ;;  %p837_p5 = scmp.lt.s32.totalorder %s835_s21, %s828_s11 }
  0x56   : > { %p832_p8 = pneg %p831_p6  ;;  %p838_p12 = por %p837_p5, %p836_p2 }
  0x58   : > { %p839_p0 = pnand %p838_p12, %p832_p8 }
  0x5a   : > { %842 = shalt.err (!%p839_p0)
}
  0x5b   : > { %s902_s23 = smov 32   ;;  %s903_s13 = smov 2  }
  0x5c   : > { %690 = dma.hbm_to_vmem [thread:$0]  (!%p984_p9), %s1080_s7, 128, %s1035_s24, %s1001_s12, %s902_s23, %s902_s23, %s903_s13  }
  0x5d   : > { %p1177_p11 = scmp.ne.s32.totalorder %s1176_s6, 0 }
  0x5e   : > { %s310_s14 = sand.u32 (!%p1177_p11), 1, %s881_s16   ;;  %p1178_p10 = scmp.ne.s32.totalorder (!%p1177_p11), %s1173_s25, 0 }
  0x5f   : > { %308 = sbr.rel (%p1177_p11) target bundleno = 181 (0xb5), region = 36  ;;  %s663_s28 = sshll.u32 (!%p1177_p11), %s310_s14, 1 }
  0x60   : > { %s311_s5 = scalar_lea.sflag (!%p1177_p11), [#allocation6], %s310_s14  ;;  %s314_s27 = scalar_lea.vmem (!%p1177_p11), [#allocation5], %s663_s28 }
  0x66   : > { %868 = dma.done.wait (%p1178_p10), %s311_s5, 32  }
  0x67   : > { %870 = vsyncadd (%p1178_p10), %s311_s5, 4294967264  ;;  %s1179_s29 = sadd.s32 4294967295, %s897_s20   ;;  %s323_s12 = scalar_lea.vmem [#allocation7], %s663_s28 }
  0x68   : > { %s319_s9 = sand.u32 1, %s1179_s29  }
  0x69   : > { %s320_s30 = scalar_lea.sflag [#allocation8], %s319_s9 }
  0x6a   : > { %872 = dma.done.wait (%p1178_p10), %s320_s30, 160  }
  0x6b   : > { %874 = vsyncadd (%p1178_p10), %s320_s30, 4294967136  ;;  %p391_p9 = scmp.lt.s32.totalorder %s889_s18, 1  ;;  %s665_s24 = sshll.u32 %s310_s14, 3  ;;  %v904_v0 = vmov 0.0   ;;  %vm420_vm0 = vcmask 1041408  }
  0x6c   : > { %412 = vst [vmem:[#allocation2] sm:$0x1] %v904_v0  ;;  %413 = vst [vmem:[#allocation3] sm:$0x1] %v904_v0  ;;  %s332_s25 = scalar_lea.vmem [#allocation9], %s665_s24 }
  0x6d   : > { %414 = vst [vmem:[#allocation4] sm:$0x1] %v904_v0  ;;  %s1188_s18 = smov (!%p391_p9, %s889_s18), 1  ;;  %v432_v2 = vld [vmem:[%s332_s25] sm:$0x3] }
  0x6e   : > { %s666_s6 = sshll.u32 %s1188_s18, 1  ;;  %v668_v3 = vld [vmem:[%s332_s25 + $0x2] sm:$0x3]  ;;  %v669_v5 = vld [vmem:[%s332_s25 + $0x4] sm:$0x3]  ;;  %s667_s15 = sshll.u32 %s1188_s18, 2 }
  0x6f   : > { %s397_s11 = scalar_lea.vmem %s1169_s3, %s666_s6  ;;  %v435_v4 = vmax.f32 %v432_v2, %v668_v3  ;;  %v670_v6 = vld [vmem:[%s332_s25 + $0x6] sm:$0x3]  ;;  %v415_v7 = vld [vmem:[%s314_s27] sm:$0x3]  ;;  %v416_v10 = vld [vmem:[%s323_s12] sm:$0x3]  ;;  %s1137_s23 = scalar_lea.vmem %s1170_s4, %s667_s15 }
  0x70   : > { %v1125_v1 = vld [vmem:[%s397_s11] sm:$0x3]  ;;  %v417_v12 = vsub.f32 %v415_v7, %v416_v10 }
  0x71   : > { %vm431_vm1 = vcmp.ge.s32.totalorder %v1125_v1, 0  ;;  %v438_v8 = vmax.f32 %v435_v4, %v669_v5  ;;  %vm446_vm2 = vcmp.eq.s32.totalorder %v1125_v1, 0  ;;  %vm452_vm3 = vcmp.eq.s32.totalorder %v1125_v1, 1 }
  0x72   : > { %v671_v9 = vsel %vm431_vm1, 1.0, %v904_v0  ;;  %v418_v15 = vand.u32 2147483647, %v417_v12  ;;  %v447_v48 = vsel %vm446_vm2, %v432_v2, 0.0  ;;  %vm458_vm4 = vcmp.eq.s32.totalorder %v1125_v1, 2 }
  0x73   : > { %v485_v11 = vsel %vm420_vm0, %v671_v9, 0.0  ;;  %v441_v13 = vmax.f32 %v438_v8, %v670_v6  ;;  %v419_v37 = vld [vmem:[#allocation2] sm:$0x1]  ;;  %v453_v49 = vsel %vm452_vm3, %v668_v3, %v447_v48  ;;  %vm464_vm5 = vcmp.eq.s32.totalorder %v1125_v1, 3 }
  0x74   : > { %v486_v14 = vrot.slane %v485_v11, 4  ;;  %v421_v21 = vsel %vm420_vm0, %v418_v15, 0.0  ;;  %v482_v32 = vld [vmem:[#allocation4] sm:$0x1]  ;;  %v459_v51 = vsel %vm458_vm4, %v669_v5, %v453_v49 }
  0x75   : > { %v442_v16 = vsub.f32 %v432_v2, %v441_v13  ;;  %v448_v17 = vsub.f32 %v668_v3, %v441_v13  ;;  %v454_v18 = vsub.f32 %v669_v5, %v441_v13  ;;  %v460_v19 = vsub.f32 %v670_v6, %v441_v13  ;;  %v472_v2 = vld [vmem:[#allocation3] sm:$0x1] }
  0x76   : > { %v487_v20 = vadd.f32 %v486_v14, %v485_v11  ;;  %v422_v26 = vrot.slane %v421_v21, 4  ;;  %v465_v52 = vsel %vm464_vm5, %v670_v6, %v459_v51 }
  0x77   : > { %v443_v22 = vmul.f32 1.442695, %v442_v16  ;;  %v449_v23 = vmul.f32 1.442695, %v448_v17  ;;  %v455_v24 = vmul.f32 1.442695, %v454_v18 }
  0x78   : > { %v461_v25 = vmul.f32 1.442695, %v460_v19  ;;  %v488_v27 = vrot.slane %v487_v20, 2  ;;  %v423_v28 = vadd.f32 %v422_v26, %v421_v21  ;;  %v469_v55 = vmul.f32 2.0, %v465_v52 }
  0x79   : > { %743 = vpow2.f32 %v443_v22 }
  0x7a   : > { %745 = vpow2.f32 %v449_v23  ;;  %v489_v29 = vadd.f32 %v488_v27, %v487_v20  ;;  %v424_v30 = vrot.slane %v423_v28, 2 }
  0x7b   : > { %747 = vpow2.f32 %v455_v24 }
  0x7c   : > { %749 = vpow2.f32 %v461_v25  ;;  %v490_v31 = vrot.slane %v489_v29, 1  ;;  %v425_v33 = vadd.f32 %v424_v30, %v423_v28 }
  0x7e   : > { %v491_v34 = vadd.f32 %v490_v31, %v489_v29  ;;  %v426_v35 = vrot.slane %v425_v33, 1 }
  0x80   : > { %v492_v36 = vadd.f32 %v491_v34, %v482_v32  ;;  %v427_v38 = vadd.f32 %v426_v35, %v425_v33 }
  0x82   : > { %493 = vst [vmem:[#allocation4] sm:$0x1] %v492_v36  ;;  %v428_v41 = vadd.f32 %v427_v38, %v419_v37 }
  0x83   : > { %v744_v39 = vpop.eup %743 }
  0x84   : > { %v746_v40 = vpop.eup %745  ;;  %429 = vst [vmem:[#allocation2] sm:$0x1] %v428_v41 }
  0x85   : > { %v748_v42 = vpop.eup %747  ;;  %v451_v43 = vadd.f32 %v746_v40, %v744_v39 }
  0x86   : > { %v750_v44 = vpop.eup %749 }
  0x87   : > { %v457_v45 = vadd.f32 %v748_v42, %v451_v43 }
  0x89   : > { %v463_v46 = vadd.f32 %v750_v44, %v457_v45  ;;  %v501_v47 = vld [vmem:[#allocation4] sm:$0x1] }
  0x8a   : > { %502 = vst [vmem:[%s1137_s23 + $0x2] sm:$0x1] %v501_v47 }
  0x8b   : > { %751 = vlog2.f32 %v463_v46  ;;  %v497_v50 = vld [vmem:[#allocation2] sm:$0x1] }
  0x8c   : > { %498 = vst [vmem:[%s1137_s23] sm:$0x1] %v497_v50 }
  0x95   : > { %v752_v53 = vpop.eup %751 }
  0x96   : > { %v467_v54 = vmul.f32 0.6931472, %v752_v53 }
  0x98   : > { %v468_v56 = vadd.f32 %v467_v54, %v441_v13 }
  0x9a   : > { %v470_v57 = vsub.f32 %v468_v56, %v469_v55 }
  0x9c   : > { %v471_v58 = vsel %vm431_vm1, %v470_v57, 0.0 }
  0x9d   : > { %v473_v59 = vsel %vm420_vm0, %v471_v58, 0.0 }
  0x9e   : > { %v474_v60 = vrot.slane %v473_v59, 4 }
  0xa0   : > { %v475_v61 = vadd.f32 %v474_v60, %v473_v59 }
  0xa2   : > { %v476_v62 = vrot.slane %v475_v61, 2 }
  0xa4   : > { %v477_v63 = vadd.f32 %v476_v62, %v475_v61 }
  0xa6   : > { %v478_v0 = vrot.slane %v477_v63, 1 }
  0xa8   : > { %v479_v3 = vadd.f32 %v478_v0, %v477_v63 }
  0xaa   : > { %v480_v4 = vadd.f32 %v479_v3, %v472_v2 }
  0xac   : > { %481 = vst [vmem:[#allocation3] sm:$0x1] %v480_v4 }
  0xb3   : > { %v499_v5 = vld [vmem:[#allocation3] sm:$0x1] }
  0xb4   : > { %500 = vst [vmem:[%s1137_s23 + $0x1] sm:$0x1] %v499_v5 }
  0xb5 PF: > { %s20_s20 = sadd.s32 1, %s897_s20   ;;  %s1180_s15 = smov %s881_s16 }
  0xb6   : > { %p17_p1 = scmp.ge.s32.totalorder %s20_s20, 4   ;;  %s1181_s16 = smov %s885_s17 }
  0xb7   : > { %s1182_s17 = smov %s977_s26  ;;  %s1183_s18 = smov %s893_s19 }
  0xb8   : > { %s1184_s19 = smov %s1186_s22  ;;  %19 = sbr.rel (!%p17_p1) target bundleno = 6 (0x6), region = 114 }
  0xbf   :  { %528 = vsyncpa [#allocation6], 1 }
  0xc0   :  { %530 = vsyncpa [#allocation6 + $0x1], 1 }
  0xc1   :  { %531 = vsyncpa [#allocation8], 1 }
  0xc2   :  { %533 = vsyncpa [#allocation8 + $0x1], 1 }

</bundles_post_ra>
